<compile_context>
chip_gen: v5e
topology: v5e:2x2
jax: 0.10.0
libtpu: 0.0.40
codegen_flags: <defaults>
</compile_context>

<pallas_src>
import jax
import jax.numpy as jnp
from jax import lax
from jax.experimental import pallas as pl
from jax.experimental.pallas import tpu as pltpu


def _round_up(x, m):
    return -(-x // m) * m


def seq2seq_forward(enc_input, enc_hidden, dec_input, params):
    """enc_input: (B, T_enc, C), enc_hidden: (1, B, H), dec_input: (B, T_dec, C).
    Returns (T_dec, B, C) like the PyTorch module."""
    enc_x = jnp.transpose(enc_input, (1, 0, 2)).astype(jnp.float32)  # (T_enc, B, C)
    dec_x = jnp.transpose(dec_input, (1, 0, 2)).astype(jnp.float32)  # (T_dec, B, C)
    h0 = enc_hidden[0].astype(jnp.float32)                           # (B, H)

    T_enc, B, C = enc_x.shape
    T_dec = dec_x.shape[0]
    H = h0.shape[1]

    # Pad batch to a full sublane tile and FC output to a full lane tile.
    B_pad = max(8, _round_up(B, 8))
    C_pad = max(128, _round_up(C, 128))
    pad_b = B_pad - B

    enc_xp = jnp.pad(enc_x, ((0, 0), (0, pad_b), (0, 0)))            # (T_enc, B_pad, C)
    dec_xp = jnp.pad(dec_x, ((0, 0), (0, pad_b), (0, 0)))            # (T_dec, B_pad, C)
    h0p = jnp.pad(h0, ((0, pad_b), (0, 0)))                          # (B_pad, H)

    # Time-major flatten + stack encoder/decoder rows for one fused input projection.
    x_all = jnp.concatenate(
        [enc_xp.reshape(T_enc * B_pad, C), dec_xp.reshape(T_dec * B_pad, C)], axis=0)

    # Prepack fused input-projection weight/bias and lane-padded FC weight/bias.
    wih_f = jnp.concatenate([params["wih_e"], params["wih_d"]], axis=1)  # (C, 2H)
    b_f = jnp.concatenate([params["b_e"], params["b_d"]], axis=1)        # (1, 2H)
    wfc_p = jnp.pad(params["wfc"], ((0, 0), (0, C_pad - C)))             # (H, C_pad)
    bfc_p = jnp.pad(params["bfc"], ((0, 0), (0, C_pad - C)))             # (1, C_pad)

    def kernel(x_all_ref, h0_ref, wih_ref, b_ref,
               whh_e_ref, whh_d_ref, wfc_ref, bfc_ref,
               out_ref, hs_ref):
        whh_e = whh_e_ref[...]
        whh_d = whh_d_ref[...]

        # --- One fused input projection for both RNNs over all timesteps. ---
        # Encoder rows use columns [0:H]; decoder rows use [H:2H] (both lane-aligned).
        xproj = jnp.dot(x_all_ref[...], wih_ref[...],
                        preferred_element_type=jnp.float32) + b_ref[...]

        # --- Encoder recurrence: fully unrolled, aligned 8-row static slices. ---
        # TODO(synk): on v5e, hold W_hh in the MXU across the unrolled steps with
        # pltpu.matmul_push_rhs / matmul_acc_lhs / matmul_pop.
        h = h0_ref[...]                                               # (B_pad, H)
        for t in range(T_enc):
            row = t * B_pad
            h = jnp.tanh(xproj[row:row + B_pad, 0:H]
                         + jnp.dot(h, whh_e, preferred_element_type=jnp.float32))

        # --- Decoder recurrence: write each h into an aligned VMEM scratch slab. ---
        for t in range(T_dec):
            row = (T_enc + t) * B_pad
            h = jnp.tanh(xproj[row:row + B_pad, H:2 * H]
                         + jnp.dot(h, whh_d, preferred_element_type=jnp.float32))
            hs_ref[t * B_pad:(t + 1) * B_pad, :] = h

        # --- FC head once over all decoder steps: lane-dense matmul + full vst. ---
        y = jnp.dot(hs_ref[...], wfc_ref[...],
                    preferred_element_type=jnp.float32) + bfc_ref[...]
        out_ref[...] = y.astype(out_ref.dtype)

    vmem = pl.BlockSpec(memory_space=pltpu.MemorySpace.VMEM)
    out2 = pl.pallas_call(
        kernel,
        out_shape=jax.ShapeDtypeStruct((T_dec * B_pad, C_pad), jnp.float32),
        in_specs=[vmem] * 8,
        out_specs=vmem,
        scratch_shapes=[pltpu.VMEM((T_dec * B_pad, H), jnp.float32)],
    )(x_all, h0p, wih_f, b_f, params["whh_e"], params["whh_d"], wfc_p, bfc_p)
    # TODO(synk): at production sizes (large B), add a batch grid axis with
    # dimension_semantics=("parallel",) so v7x's two TensorCores split the batch,
    # and re-derive VMEM budgets against v7x's 64 MiB.
    return out2.reshape(T_dec, B_pad, C_pad)[:, :B, :C]


def init_params(key, n_class, n_hidden):
    """Deterministic init mirroring nn.RNN / nn.Linear shapes (uniform(-1/sqrt(H), 1/sqrt(H))).
    Weights stored transposed for x @ W; RNN biases (b_ih + b_hh) are pre-summed."""
    ks = jax.random.split(key, 10)
    s = 1.0 / jnp.sqrt(jnp.float32(n_hidden))
    u = lambda k, shape: jax.random.uniform(k, shape, jnp.float32, -s, s)
    return {
        "wih_e": u(ks[0], (n_class, n_hidden)),
        "whh_e": u(ks[1], (n_hidden, n_hidden)),
        "b_e":   u(ks[2], (1, n_hidden)) + u(ks[3], (1, n_hidden)),
        "wih_d": u(ks[4], (n_class, n_hidden)),
        "whh_d": u(ks[5], (n_hidden, n_hidden)),
        "b_d":   u(ks[6], (1, n_hidden)) + u(ks[7], (1, n_hidden)),
        "wfc":   u(ks[8], (n_hidden, n_class)),
        "bfc":   u(ks[9], (1, n_class)),
    }


def seq2seq_reference(enc_input, enc_hidden, dec_input, p):
    """Pure-JAX reference of the same forward pass (for a correctness check)."""
    dot = lambda a, b: lax.dot(a, b, precision=lax.Precision.HIGHEST)
    enc_x = jnp.transpose(enc_input, (1, 0, 2))
    dec_x = jnp.transpose(dec_input, (1, 0, 2))
    h = enc_hidden[0]

    def enc_step(h, x):
        h = jnp.tanh(dot(x, p["wih_e"]) + dot(h, p["whh_e"]) + p["b_e"])
        return h, None

    h, _ = lax.scan(enc_step, h, enc_x)

    def dec_step(h, x):
        h = jnp.tanh(dot(x, p["wih_d"]) + dot(h, p["whh_d"]) + p["b_d"])
        return h, dot(h, p["wfc"]) + p["bfc"]

    _, ys = lax.scan(dec_step, h, dec_x)
    return ys


if __name__ == "__main__":
    n_class, n_hidden = 10, 128       # module defaults: n_class=10, n_hidden=128
    batch, t_enc, t_dec = 2, 8, 8

    key = jax.random.PRNGKey(0)
    k_p, k_e, k_h, k_d = jax.random.split(key, 4)

    params = init_params(k_p, n_class, n_hidden)
    enc_input = jax.random.normal(k_e, (batch, t_enc, n_class), jnp.float32)
    enc_hidden = jax.random.normal(k_h, (1, batch, n_hidden), jnp.float32)
    dec_input = jax.random.normal(k_d, (batch, t_dec, n_class), jnp.float32)

    out = seq2seq_forward(enc_input, enc_hidden, dec_input, params)
    out = jax.block_until_ready(out)

    ref = jax.block_until_ready(
        seq2seq_reference(enc_input, enc_hidden, dec_input, params))
    assert out.shape == (t_dec, batch, n_class)
    assert jnp.allclose(out, ref, atol=1e-4, rtol=1e-4)

    print("KERNEL_OK")
</pallas_src>

<mosaic_0001>
module attributes {stable_mosaic.version = 11 : i64} {
  func.func @kernel(%arg0: memref<128x10xf32, #tpu.memory_space<vmem>>, %arg1: memref<8x128xf32, #tpu.memory_space<vmem>>, %arg2: memref<10x256xf32, #tpu.memory_space<vmem>>, %arg3: memref<1x256xf32, #tpu.memory_space<vmem>>, %arg4: memref<128x128xf32, #tpu.memory_space<vmem>>, %arg5: memref<128x128xf32, #tpu.memory_space<vmem>>, %arg6: memref<128x128xf32, #tpu.memory_space<vmem>>, %arg7: memref<1x128xf32, #tpu.memory_space<vmem>>, %arg8: memref<64x128xf32, #tpu.memory_space<vmem>>, %arg9: memref<64x128xf32, #tpu.memory_space<vmem>>) attributes {dimension_semantics = [], scalar_prefetch = 0 : i64, scratch_operands = 1 : i64, tpu.core_type = #tpu.core_type<tc>} {
    %c0 = arith.constant 0 : index
    %c0_0 = arith.constant 0 : index
    %0 = vector.load %arg4[%c0, %c0_0] : memref<128x128xf32, #tpu.memory_space<vmem>>, vector<128x128xf32>
    %c0_1 = arith.constant 0 : index
    %c0_2 = arith.constant 0 : index
    %1 = vector.load %arg5[%c0_1, %c0_2] : memref<128x128xf32, #tpu.memory_space<vmem>>, vector<128x128xf32>
    %c0_3 = arith.constant 0 : index
    %c0_4 = arith.constant 0 : index
    %2 = vector.load %arg0[%c0_3, %c0_4] : memref<128x10xf32, #tpu.memory_space<vmem>>, vector<128x10xf32>
    %c0_5 = arith.constant 0 : index
    %c0_6 = arith.constant 0 : index
    %3 = vector.load %arg2[%c0_5, %c0_6] : memref<10x256xf32, #tpu.memory_space<vmem>>, vector<10x256xf32>
    %cst = arith.constant dense<0.000000e+00> : vector<128x256xf32>
    %4 = tpu.matmul %2, %3, %cst {dimension_numbers = #tpu.dot_dimension_numbers<[1], [0], [0], [1], [0, 0, 1, 1], [], []>} : vector<128x10xf32>, vector<10x256xf32>, vector<128x256xf32> -> vector<128x256xf32>
    %c0_7 = arith.constant 0 : index
    %c0_8 = arith.constant 0 : index
    %5 = vector.load %arg3[%c0_7, %c0_8] : memref<1x256xf32, #tpu.memory_space<vmem>>, vector<1x256xf32>
    %6 = vector.broadcast %5 : vector<1x256xf32> to vector<128x256xf32>
    %7 = arith.addf %4, %6 : vector<128x256xf32>
    %c0_9 = arith.constant 0 : index
    %c0_10 = arith.constant 0 : index
    %8 = vector.load %arg1[%c0_9, %c0_10] : memref<8x128xf32, #tpu.memory_space<vmem>>, vector<8x128xf32>
    %9 = vector.extract_strided_slice %7 {offsets = [0, 0], sizes = [8, 128], strides = [1, 1]} : vector<128x256xf32> to vector<8x128xf32>
    %cst_11 = arith.constant dense<0.000000e+00> : vector<8x128xf32>
    %10 = tpu.matmul %8, %0, %cst_11 {dimension_numbers = #tpu.dot_dimension_numbers<[1], [0], [0], [1], [0, 0, 1, 1], [], []>} : vector<8x128xf32>, vector<128x128xf32>, vector<8x128xf32> -> vector<8x128xf32>
    %11 = arith.addf %9, %10 : vector<8x128xf32>
    %12 = math.tanh %11 : vector<8x128xf32>
    %13 = vector.extract_strided_slice %7 {offsets = [8, 0], sizes = [8, 128], strides = [1, 1]} : vector<128x256xf32> to vector<8x128xf32>
    %cst_12 = arith.constant dense<0.000000e+00> : vector<8x128xf32>
    %14 = tpu.matmul %12, %0, %cst_12 {dimension_numbers = #tpu.dot_dimension_numbers<[1], [0], [0], [1], [0, 0, 1, 1], [], []>} : vector<8x128xf32>, vector<128x128xf32>, vector<8x128xf32> -> vector<8x128xf32>
    %15 = arith.addf %13, %14 : vector<8x128xf32>
    %16 = math.tanh %15 : vector<8x128xf32>
    %17 = vector.extract_strided_slice %7 {offsets = [16, 0], sizes = [8, 128], strides = [1, 1]} : vector<128x256xf32> to vector<8x128xf32>
    %cst_13 = arith.constant dense<0.000000e+00> : vector<8x128xf32>
    %18 = tpu.matmul %16, %0, %cst_13 {dimension_numbers = #tpu.dot_dimension_numbers<[1], [0], [0], [1], [0, 0, 1, 1], [], []>} : vector<8x128xf32>, vector<128x128xf32>, vector<8x128xf32> -> vector<8x128xf32>
    %19 = arith.addf %17, %18 : vector<8x128xf32>
    %20 = math.tanh %19 : vector<8x128xf32>
    %21 = vector.extract_strided_slice %7 {offsets = [24, 0], sizes = [8, 128], strides = [1, 1]} : vector<128x256xf32> to vector<8x128xf32>
    %cst_14 = arith.constant dense<0.000000e+00> : vector<8x128xf32>
    %22 = tpu.matmul %20, %0, %cst_14 {dimension_numbers = #tpu.dot_dimension_numbers<[1], [0], [0], [1], [0, 0, 1, 1], [], []>} : vector<8x128xf32>, vector<128x128xf32>, vector<8x128xf32> -> vector<8x128xf32>
    %23 = arith.addf %21, %22 : vector<8x128xf32>
    %24 = math.tanh %23 : vector<8x128xf32>
    %25 = vector.extract_strided_slice %7 {offsets = [32, 0], sizes = [8, 128], strides = [1, 1]} : vector<128x256xf32> to vector<8x128xf32>
    %cst_15 = arith.constant dense<0.000000e+00> : vector<8x128xf32>
    %26 = tpu.matmul %24, %0, %cst_15 {dimension_numbers = #tpu.dot_dimension_numbers<[1], [0], [0], [1], [0, 0, 1, 1], [], []>} : vector<8x128xf32>, vector<128x128xf32>, vector<8x128xf32> -> vector<8x128xf32>
    %27 = arith.addf %25, %26 : vector<8x128xf32>
    %28 = math.tanh %27 : vector<8x128xf32>
    %29 = vector.extract_strided_slice %7 {offsets = [40, 0], sizes = [8, 128], strides = [1, 1]} : vector<128x256xf32> to vector<8x128xf32>
    %cst_16 = arith.constant dense<0.000000e+00> : vector<8x128xf32>
    %30 = tpu.matmul %28, %0, %cst_16 {dimension_numbers = #tpu.dot_dimension_numbers<[1], [0], [0], [1], [0, 0, 1, 1], [], []>} : vector<8x128xf32>, vector<128x128xf32>, vector<8x128xf32> -> vector<8x128xf32>
    %31 = arith.addf %29, %30 : vector<8x128xf32>
    %32 = math.tanh %31 : vector<8x128xf32>
    %33 = vector.extract_strided_slice %7 {offsets = [48, 0], sizes = [8, 128], strides = [1, 1]} : vector<128x256xf32> to vector<8x128xf32>
    %cst_17 = arith.constant dense<0.000000e+00> : vector<8x128xf32>
    %34 = tpu.matmul %32, %0, %cst_17 {dimension_numbers = #tpu.dot_dimension_numbers<[1], [0], [0], [1], [0, 0, 1, 1], [], []>} : vector<8x128xf32>, vector<128x128xf32>, vector<8x128xf32> -> vector<8x128xf32>
    %35 = arith.addf %33, %34 : vector<8x128xf32>
    %36 = math.tanh %35 : vector<8x128xf32>
    %37 = vector.extract_strided_slice %7 {offsets = [56, 0], sizes = [8, 128], strides = [1, 1]} : vector<128x256xf32> to vector<8x128xf32>
    %cst_18 = arith.constant dense<0.000000e+00> : vector<8x128xf32>
    %38 = tpu.matmul %36, %0, %cst_18 {dimension_numbers = #tpu.dot_dimension_numbers<[1], [0], [0], [1], [0, 0, 1, 1], [], []>} : vector<8x128xf32>, vector<128x128xf32>, vector<8x128xf32> -> vector<8x128xf32>
    %39 = arith.addf %37, %38 : vector<8x128xf32>
    %40 = math.tanh %39 : vector<8x128xf32>
    %41 = vector.extract_strided_slice %7 {offsets = [64, 128], sizes = [8, 128], strides = [1, 1]} : vector<128x256xf32> to vector<8x128xf32>
    %cst_19 = arith.constant dense<0.000000e+00> : vector<8x128xf32>
    %42 = tpu.matmul %40, %1, %cst_19 {dimension_numbers = #tpu.dot_dimension_numbers<[1], [0], [0], [1], [0, 0, 1, 1], [], []>} : vector<8x128xf32>, vector<128x128xf32>, vector<8x128xf32> -> vector<8x128xf32>
    %43 = arith.addf %41, %42 : vector<8x128xf32>
    %44 = math.tanh %43 : vector<8x128xf32>
    %c0_20 = arith.constant 0 : index
    %c0_21 = arith.constant 0 : index
    %45 = vector.load %arg9[%c0_20, %c0_21] : memref<64x128xf32, #tpu.memory_space<vmem>>, vector<8x128xf32>
    tpu.vector_store %arg9[%c0_20, %c0_21], %44 {strides = array<i32>} : memref<64x128xf32, #tpu.memory_space<vmem>>, vector<8x128xf32>,
    %46 = vector.extract_strided_slice %7 {offsets = [72, 128], sizes = [8, 128], strides = [1, 1]} : vector<128x256xf32> to vector<8x128xf32>
    %cst_22 = arith.constant dense<0.000000e+00> : vector<8x128xf32>
    %47 = tpu.matmul %44, %1, %cst_22 {dimension_numbers = #tpu.dot_dimension_numbers<[1], [0], [0], [1], [0, 0, 1, 1], [], []>} : vector<8x128xf32>, vector<128x128xf32>, vector<8x128xf32> -> vector<8x128xf32>
    %48 = arith.addf %46, %47 : vector<8x128xf32>
    %49 = math.tanh %48 : vector<8x128xf32>
    %c8 = arith.constant 8 : index
    %c0_23 = arith.constant 0 : index
    %50 = vector.load %arg9[%c8, %c0_23] : memref<64x128xf32, #tpu.memory_space<vmem>>, vector<8x128xf32>
    tpu.vector_store %arg9[%c8, %c0_23], %49 {strides = array<i32>} : memref<64x128xf32, #tpu.memory_space<vmem>>, vector<8x128xf32>,
    %51 = vector.extract_strided_slice %7 {offsets = [80, 128], sizes = [8, 128], strides = [1, 1]} : vector<128x256xf32> to vector<8x128xf32>
    %cst_24 = arith.constant dense<0.000000e+00> : vector<8x128xf32>
    %52 = tpu.matmul %49, %1, %cst_24 {dimension_numbers = #tpu.dot_dimension_numbers<[1], [0], [0], [1], [0, 0, 1, 1], [], []>} : vector<8x128xf32>, vector<128x128xf32>, vector<8x128xf32> -> vector<8x128xf32>
    %53 = arith.addf %51, %52 : vector<8x128xf32>
    %54 = math.tanh %53 : vector<8x128xf32>
    %c16 = arith.constant 16 : index
    %c0_25 = arith.constant 0 : index
    %55 = vector.load %arg9[%c16, %c0_25] : memref<64x128xf32, #tpu.memory_space<vmem>>, vector<8x128xf32>
    tpu.vector_store %arg9[%c16, %c0_25], %54 {strides = array<i32>} : memref<64x128xf32, #tpu.memory_space<vmem>>, vector<8x128xf32>,
    %56 = vector.extract_strided_slice %7 {offsets = [88, 128], sizes = [8, 128], strides = [1, 1]} : vector<128x256xf32> to vector<8x128xf32>
    %cst_26 = arith.constant dense<0.000000e+00> : vector<8x128xf32>
    %57 = tpu.matmul %54, %1, %cst_26 {dimension_numbers = #tpu.dot_dimension_numbers<[1], [0], [0], [1], [0, 0, 1, 1], [], []>} : vector<8x128xf32>, vector<128x128xf32>, vector<8x128xf32> -> vector<8x128xf32>
    %58 = arith.addf %56, %57 : vector<8x128xf32>
    %59 = math.tanh %58 : vector<8x128xf32>
    %c24 = arith.constant 24 : index
    %c0_27 = arith.constant 0 : index
    %60 = vector.load %arg9[%c24, %c0_27] : memref<64x128xf32, #tpu.memory_space<vmem>>, vector<8x128xf32>
    tpu.vector_store %arg9[%c24, %c0_27], %59 {strides = array<i32>} : memref<64x128xf32, #tpu.memory_space<vmem>>, vector<8x128xf32>,
    %61 = vector.extract_strided_slice %7 {offsets = [96, 128], sizes = [8, 128], strides = [1, 1]} : vector<128x256xf32> to vector<8x128xf32>
    %cst_28 = arith.constant dense<0.000000e+00> : vector<8x128xf32>
    %62 = tpu.matmul %59, %1, %cst_28 {dimension_numbers = #tpu.dot_dimension_numbers<[1], [0], [0], [1], [0, 0, 1, 1], [], []>} : vector<8x128xf32>, vector<128x128xf32>, vector<8x128xf32> -> vector<8x128xf32>
    %63 = arith.addf %61, %62 : vector<8x128xf32>
    %64 = math.tanh %63 : vector<8x128xf32>
    %c32 = arith.constant 32 : index
    %c0_29 = arith.constant 0 : index
    %65 = vector.load %arg9[%c32, %c0_29] : memref<64x128xf32, #tpu.memory_space<vmem>>, vector<8x128xf32>
    tpu.vector_store %arg9[%c32, %c0_29], %64 {strides = array<i32>} : memref<64x128xf32, #tpu.memory_space<vmem>>, vector<8x128xf32>,
    %66 = vector.extract_strided_slice %7 {offsets = [104, 128], sizes = [8, 128], strides = [1, 1]} : vector<128x256xf32> to vector<8x128xf32>
    %cst_30 = arith.constant dense<0.000000e+00> : vector<8x128xf32>
    %67 = tpu.matmul %64, %1, %cst_30 {dimension_numbers = #tpu.dot_dimension_numbers<[1], [0], [0], [1], [0, 0, 1, 1], [], []>} : vector<8x128xf32>, vector<128x128xf32>, vector<8x128xf32> -> vector<8x128xf32>
    %68 = arith.addf %66, %67 : vector<8x128xf32>
    %69 = math.tanh %68 : vector<8x128xf32>
    %c40 = arith.constant 40 : index
    %c0_31 = arith.constant 0 : index
    %70 = vector.load %arg9[%c40, %c0_31] : memref<64x128xf32, #tpu.memory_space<vmem>>, vector<8x128xf32>
    tpu.vector_store %arg9[%c40, %c0_31], %69 {strides = array<i32>} : memref<64x128xf32, #tpu.memory_space<vmem>>, vector<8x128xf32>,
    %71 = vector.extract_strided_slice %7 {offsets = [112, 128], sizes = [8, 128], strides = [1, 1]} : vector<128x256xf32> to vector<8x128xf32>
    %cst_32 = arith.constant dense<0.000000e+00> : vector<8x128xf32>
    %72 = tpu.matmul %69, %1, %cst_32 {dimension_numbers = #tpu.dot_dimension_numbers<[1], [0], [0], [1], [0, 0, 1, 1], [], []>} : vector<8x128xf32>, vector<128x128xf32>, vector<8x128xf32> -> vector<8x128xf32>
    %73 = arith.addf %71, %72 : vector<8x128xf32>
    %74 = math.tanh %73 : vector<8x128xf32>
    %c48 = arith.constant 48 : index
    %c0_33 = arith.constant 0 : index
    %75 = vector.load %arg9[%c48, %c0_33] : memref<64x128xf32, #tpu.memory_space<vmem>>, vector<8x128xf32>
    tpu.vector_store %arg9[%c48, %c0_33], %74 {strides = array<i32>} : memref<64x128xf32, #tpu.memory_space<vmem>>, vector<8x128xf32>,
    %76 = vector.extract_strided_slice %7 {offsets = [120, 128], sizes = [8, 128], strides = [1, 1]} : vector<128x256xf32> to vector<8x128xf32>
    %cst_34 = arith.constant dense<0.000000e+00> : vector<8x128xf32>
    %77 = tpu.matmul %74, %1, %cst_34 {dimension_numbers = #tpu.dot_dimension_numbers<[1], [0], [0], [1], [0, 0, 1, 1], [], []>} : vector<8x128xf32>, vector<128x128xf32>, vector<8x128xf32> -> vector<8x128xf32>
    %78 = arith.addf %76, %77 : vector<8x128xf32>
    %79 = math.tanh %78 : vector<8x128xf32>
    %c56 = arith.constant 56 : index
    %c0_35 = arith.constant 0 : index
    %80 = vector.load %arg9[%c56, %c0_35] : memref<64x128xf32, #tpu.memory_space<vmem>>, vector<8x128xf32>
    tpu.vector_store %arg9[%c56, %c0_35], %79 {strides = array<i32>} : memref<64x128xf32, #tpu.memory_space<vmem>>, vector<8x128xf32>,
    %c0_36 = arith.constant 0 : index
    %c0_37 = arith.constant 0 : index
    %81 = vector.load %arg9[%c0_36, %c0_37] : memref<64x128xf32, #tpu.memory_space<vmem>>, vector<64x128xf32>
    %c0_38 = arith.constant 0 : index
    %c0_39 = arith.constant 0 : index
    %82 = vector.load %arg6[%c0_38, %c0_39] : memref<128x128xf32, #tpu.memory_space<vmem>>, vector<128x128xf32>
    %cst_40 = arith.constant dense<0.000000e+00> : vector<64x128xf32>
    %83 = tpu.matmul %81, %82, %cst_40 {dimension_numbers = #tpu.dot_dimension_numbers<[1], [0], [0], [1], [0, 0, 1, 1], [], []>} : vector<64x128xf32>, vector<128x128xf32>, vector<64x128xf32> -> vector<64x128xf32>
    %c0_41 = arith.constant 0 : index
    %c0_42 = arith.constant 0 : index
    %84 = vector.load %arg7[%c0_41, %c0_42] : memref<1x128xf32, #tpu.memory_space<vmem>>, vector<1x128xf32>
    %85 = vector.broadcast %84 : vector<1x128xf32> to vector<64x128xf32>
    %86 = arith.addf %83, %85 : vector<64x128xf32>
    %c0_43 = arith.constant 0 : index
    %c0_44 = arith.constant 0 : index
    %87 = vector.load %arg8[%c0_43, %c0_44] : memref<64x128xf32, #tpu.memory_space<vmem>>, vector<64x128xf32>
    tpu.vector_store %arg8[%c0_43, %c0_44], %86 {strides = array<i32>} : memref<64x128xf32, #tpu.memory_space<vmem>>, vector<64x128xf32>,
    return
  }
}

</mosaic_0001>

<bundles_post_ra>
// kernel: tpu_custom_call.1
= control target key start
LH: loop header
LB: loop body
LE: loop exit
PB: predicated region body
PF: predicated region fallthrough
CT: control target
= control target key end

     0   :  { %13 = vsyncpa [#allocation4], 0  ;;  %s1572_s0 = inlined_call_operand.vmem [shape: f32[128,10], index: 0, kind: input, shape index: {}]   ;;  %s1573_s1 = inlined_call_operand.vmem [shape: f32[8,128], index: 1, kind: input, shape index: {}]   ;;  %s1574_s2 = inlined_call_operand.hbm [shape: f32[10,256], index: 2, kind: input, shape index: {}]   ;;  %s1575_s3 = inlined_call_operand.vmem [shape: f32[1,256], index: 3, kind: input, shape index: {}]   ;;  %s1576_s4 = inlined_call_operand.vmem [shape: f32[128,128], index: 4, kind: input, shape index: {}]   ;;  %s1577_s5 = inlined_call_operand.hbm [shape: f32[128,128], index: 5, kind: input, shape index: {}]   ;;  %s1578_s6 = inlined_call_operand.hbm [shape: f32[128,128], index: 6, kind: input, shape index: {}]   ;;  %s1579_s7 = inlined_call_operand.vmem [shape: f32[1,128], index: 7, kind: input, shape index: {}]   ;;  %s1580_s8 = inlined_call_operand.hbm [shape: f32[64,128], index: 8, kind: output, shape index: {}]  }
   0x1   :  { %14 = vsyncpa [#allocation7], 0  ;;  %s41_s29 = sshll.u32 %s1577_s5, 4  ;;  %s42_s29 = int_to_ptr.hbm [resolvable:$true] %s41_s29 }
   0x2   :  { %15 = vsyncpa [#allocation5], 0  ;;  %s944_s30 = smov [#allocation6]   ;;  %s24_s12 = sshll.u32 %s1574_s2, 4  ;;  %s25_s12 = int_to_ptr.hbm [resolvable:$true] %s24_s12 }
   0x3   :  { %s43_s9 = sshll.u32 %s944_s30, 4  ;;  %s945_s13 = smov 128   ;;  %s44_s9 = int_to_ptr.vmem [resolvable:$true] %s43_s9 }
   0x4   :  { %s946_s14 = smov 8   ;;  %s947_s15 = smov [#allocation3]  }
   0x5   :  { %49 = dma.hbm_to_vmem [thread:$0]  %s42_s29, 2048, %s44_s9, [#allocation7], %s945_s13, %s945_s13, %s946_s14  }
   0x6   :  { %s26_s16 = sshll.u32 %s947_s15, 4  ;;  %s948_s5 = smov 256   ;;  %s27_s16 = int_to_ptr.vmem [resolvable:$true] %s26_s16 }
   0x7   :  { %s949_s17 = smov 16   ;;  %s54_s20 = sshll.u32 %s1578_s6, 4  ;;  %s55_s20 = int_to_ptr.hbm [resolvable:$true] %s54_s20 }
   0x8   :  { %32 = dma.hbm_to_vmem [thread:$0]  %s25_s12, 512, %s27_s16, [#allocation4], %s948_s5, %s948_s5, %s949_s17  }
   0x9   :  { %s950_s21 = smov [#allocation8]  }
   0xa   :  { %s56_s2 = sshll.u32 %s950_s21, 4  ;;  %s57_s2 = int_to_ptr.vmem [resolvable:$true] %s56_s2 }
   0xb   :  { %62 = dma.hbm_to_vmem [thread:$0]  %s55_s20, 2048, %s57_s2, [#allocation7], %s945_s13, %s945_s13, %s946_s14  }
   0xc   :  { %938 = dma.done.wait [#allocation4], 512  }
   0xd   :  { %939 = vsyncadd [#allocation4], 4294966784 }
   0xe   :  { %940 = dma.done.wait [#allocation7], 4096  }
   0xf   :  { %941 = vsyncadd [#allocation7], 4294963200  ;;  %vm184_vm0 = vcmask 1041408   ;;  %v127_v0 = vld [vmem:[#allocation3 + $0x10] sm:$0x3]  ;;  %v125_v1 = vld [vmem:[#allocation3] sm:$0xff] }
  0x10   :  { %798 = vmatpush.msk.msra.mxu2 %vm184_vm0, %v127_v0  ;;  %v1016_v2 = vld [vmem:[%s1572_s0 + $0x60] sm:$0xff]  ;;  %vm135_vm1 = vcmask 80896   ;;  %v1021_v3 = vld [vmem:[%s1576_s4 + $0x78] sm:$0xff]  ;;  %763 = vmatpush.msk.msra.mxu0 %vm184_vm0, %v127_v0  ;;  %v1029_v4 = vld [vmem:[%s1576_s4 + $0x70] sm:$0xff]  ;;  %s749_s21 = sshll.u32 %s1580_s8, 4  ;;  %s750_s21 = int_to_ptr.hbm [resolvable:$true] %s749_s21 }
  0x11   :  { %328 = vmatpush.msra.mxu3 %v1021_v3  ;;  %797 = vmatpush.msk.msra.mxu1 %vm184_vm0, %v127_v0  ;;  %v1038_v5 = vld [vmem:[%s1576_s4 + $0x68] sm:$0xff]  ;;  %v1045_v6 = vld [vmem:[%s1576_s4 + $0x60] sm:$0xff]  ;;  %v1064_v9 = vld [vmem:[%s1576_s4 + $0x58] sm:$0xff] }
  0x12   :  { %800 = vmatpush.msra.mxu2 %v125_v1  ;;  %206 = vmatpush.msra.mxu0 %v125_v1  ;;  %v1050_v7 = vld [vmem:[%s1572_s0] sm:$0xff]  ;;  %v1059_v8 = vld [vmem:[%s1572_s0 + $0x68] sm:$0xff]  ;;  %v1071_v10 = vld [vmem:[%s1576_s4 + $0x50] sm:$0xff] }
  0x13   :  { %776 = vmatmul.msk.f32.vlgmr.msra.gmra.mxu2 %vm135_vm1, %v1016_v2  ;;  %329 = vmatpush.msra.mxu3 %v1029_v4  ;;  %v1080_v11 = vld [vmem:[%s1576_s4 + $0x48] sm:$0xff]  ;;  %v1087_v12 = vld [vmem:[%s1576_s4 + $0x40] sm:$0xff]  ;;  %v1094_v13 = vld [vmem:[%s1572_s0 + $0x70] sm:$0xff] }
  0x14   :  { %306 = vmatpush.msrb.mxu2 %v1021_v3  ;;  %799 = vmatpush.msra.mxu1 %v125_v1  ;;  %v1099_v14 = vld [vmem:[%s1576_s4 + $0x38] sm:$0xff]  ;;  %v1106_v15 = vld [vmem:[%s1576_s4 + $0x30] sm:$0xff]  ;;  %v1115_v16 = vld [vmem:[%s1576_s4 + $0x28] sm:$0xff] }
  0x15   :  { %330 = vmatpush.msra.mxu3 %v1038_v5  ;;  %764 = vmatmul.msk.f32.vlgmr.msra.gmra.mxu0 %vm135_vm1, %v1050_v7  ;;  %v1122_v17 = vld [vmem:[%s1576_s4 + $0x20] sm:$0xff]  ;;  %v1129_v18 = vld [vmem:[%s1572_s0 + $0x78] sm:$0xff]  ;;  %v1141_v20 = vld [vmem:[%s1576_s4 + $0x10] sm:$0xff] }
  0x16   :  { %307 = vmatpush.msrb.mxu2 %v1029_v4  ;;  %v1134_v19 = vld [vmem:[%s1576_s4 + $0x18] sm:$0xff]  ;;  %v1150_v21 = vld [vmem:[%s1576_s4 + $0x8] sm:$0xff]  ;;  %v1157_v22 = vld [vmem:[%s1576_s4] sm:$0xff] }
  0x17   :  { %331 = vmatpush.msra.mxu3 %v1045_v6  ;;  %v305_v23 = vld [vmem:[%s1573_s1] sm:$0xff]  ;;  %v1216_v26 = vld [vmem:[%s1572_s0 + $0x8] sm:$0xff]  ;;  %v1248_v36 = vld [vmem:[%s1572_s0 + $0x10] sm:$0xff] }
  0x18   :  { %308 = vmatpush.msrb.mxu2 %v1038_v5  ;;  %v1223_v28 = vld [vmem:[%s1575_s3] sm:$0x3]  ;;  %v1272_v42 = vld [vmem:[%s1572_s0 + $0x18] sm:$0xff]  ;;  %v1304_v54 = vld [vmem:[%s1572_s0 + $0x28] sm:$0xff] }
  0x19   :  { %332 = vmatpush.msra.mxu3 %v1064_v9  ;;  %v1226_v30 = vperm.slane %v1223_v28, 0  ;;  %v1296_v48 = vld [vmem:[%s1572_s0 + $0x20] sm:$0xff]  ;;  %v1312_v60 = vld [vmem:[%s1572_s0 + $0x30] sm:$0xff] }
  0x1a   :  { %309 = vmatpush.msrb.mxu2 %v1045_v6 }
  0x1b   :  { %777 = vmatmul.msk.f32.gmra.mxu2 %vm135_vm1, %v1059_v8  ;;  %333 = vmatpush.msra.mxu3 %v1071_v10 }
  0x1c   :  { %310 = vmatpush.msrb.mxu2 %v1064_v9 }
  0x1d   :  { %334 = vmatpush.msra.mxu3 %v1080_v11  ;;  %765 = vmatmul.msk.f32.gmra.mxu0 %vm135_vm1, %v1216_v26 }
  0x1e   :  { %311 = vmatpush.msrb.mxu2 %v1071_v10 }
  0x1f   :  { %335 = vmatpush.msra.mxu3 %v1087_v12 }
  0x20   :  { %312 = vmatpush.msrb.mxu2 %v1080_v11 }
  0x21   :  { %336 = vmatpush.msra.mxu3 %v1099_v14 }
  0x22   :  { %313 = vmatpush.msrb.mxu2 %v1087_v12 }
  0x23   :  { %778 = vmatmul.msk.f32.gmra.mxu2 %vm135_vm1, %v1094_v13  ;;  %337 = vmatpush.msra.mxu3 %v1106_v15 }
  0x24   :  { %314 = vmatpush.msrb.mxu2 %v1099_v14 }
  0x25   :  { %338 = vmatpush.msra.mxu3 %v1115_v16  ;;  %766 = vmatmul.msk.f32.gmra.mxu0 %vm135_vm1, %v1248_v36 }
  0x26   :  { %315 = vmatpush.msrb.mxu2 %v1106_v15 }
  0x27   :  { %339 = vmatpush.msra.mxu3 %v1122_v17 }
  0x28   :  { %316 = vmatpush.msrb.mxu2 %v1115_v16 }
  0x29   :  { %340 = vmatpush.msra.mxu3 %v1134_v19 }
  0x2a   :  { %317 = vmatpush.msrb.mxu2 %v1122_v17 }
  0x2b   :  { %779 = vmatmul.msk.f32.gmra.mxu2 %vm135_vm1, %v1129_v18  ;;  %341 = vmatpush.msra.mxu3 %v1141_v20 }
  0x2c   :  { %318 = vmatpush.msrb.mxu2 %v1134_v19 }
  0x2d   :  { %342 = vmatpush.msra.mxu3 %v1150_v21  ;;  %767 = vmatmul.msk.f32.gmra.mxu0 %vm135_vm1, %v1272_v42 }
  0x2e   :  { %319 = vmatpush.msrb.mxu2 %v1141_v20 }
  0x2f   :  { %343 = vmatpush.msra.mxu3 %v1157_v22 }
  0x30   :  { %320 = vmatpush.msrb.mxu2 %v1150_v21 }
  0x31   :  { %372 = vmatpush.msrb.mxu3 %v1021_v3 }
  0x32   :  { %321 = vmatpush.msrb.mxu2 %v1157_v22 }
  0x33   :  { %373 = vmatpush.msrb.mxu3 %v1029_v4  ;;  %322 = vmatmul.f32.vlgmr.msrb.gmra.mxu2 %v305_v23 }
  0x34   :  { %350 = vmatpush.msra.mxu2 %v1021_v3 }
  0x35   :  { %374 = vmatpush.msrb.mxu3 %v1038_v5  ;;  %768 = vmatmul.msk.f32.gmra.mxu0 %vm135_vm1, %v1296_v48 }
  0x36   :  { %351 = vmatpush.msra.mxu2 %v1029_v4 }
  0x37   :  { %375 = vmatpush.msrb.mxu3 %v1045_v6 }
  0x38   :  { %352 = vmatpush.msra.mxu2 %v1038_v5 }
  0x39   :  { %376 = vmatpush.msrb.mxu3 %v1064_v9 }
  0x3a   :  { %353 = vmatpush.msra.mxu2 %v1045_v6 }
  0x3b   :  { %377 = vmatpush.msrb.mxu3 %v1071_v10 }
  0x3c   :  { %354 = vmatpush.msra.mxu2 %v1064_v9 }
  0x3d   :  { %378 = vmatpush.msrb.mxu3 %v1080_v11  ;;  %769 = vmatmul.msk.f32.gmra.mxu0 %vm135_vm1, %v1304_v54 }
  0x3e   :  { %355 = vmatpush.msra.mxu2 %v1071_v10 }
  0x3f   :  { %379 = vmatpush.msrb.mxu3 %v1087_v12 }
  0x40   :  { %356 = vmatpush.msra.mxu2 %v1080_v11 }
  0x41   :  { %380 = vmatpush.msrb.mxu3 %v1099_v14 }
  0x42   :  { %357 = vmatpush.msra.mxu2 %v1087_v12 }
  0x43   :  { %381 = vmatpush.msrb.mxu3 %v1106_v15 }
  0x44   :  { %358 = vmatpush.msra.mxu2 %v1099_v14 }
  0x45   :  { %382 = vmatpush.msrb.mxu3 %v1115_v16  ;;  %770 = vmatmul.msk.f32.gmra.mxu0 %vm135_vm1, %v1312_v60 }
  0x46   :  { %359 = vmatpush.msra.mxu2 %v1106_v15 }
  0x47   :  { %383 = vmatpush.msrb.mxu3 %v1122_v17 }
  0x48   :  { %360 = vmatpush.msra.mxu2 %v1115_v16 }
  0x49   :  { %384 = vmatpush.msrb.mxu3 %v1134_v19 }
  0x4a   :  { %361 = vmatpush.msra.mxu2 %v1122_v17 }
  0x4b   :  { %385 = vmatpush.msrb.mxu3 %v1141_v20 }
  0x4c   :  { %362 = vmatpush.msra.mxu2 %v1134_v19 }
  0x4d   :  { %386 = vmatpush.msrb.mxu3 %v1150_v21 }
  0x4e   :  { %363 = vmatpush.msra.mxu2 %v1141_v20 }
  0x4f   :  { %387 = vmatpush.msrb.mxu3 %v1157_v22 }
  0x50   :  { %364 = vmatpush.msra.mxu2 %v1150_v21 }
  0x52   :  { %365 = vmatpush.msra.mxu2 %v1157_v22 }
  0x54   :  { %394 = vmatpush.msrb.mxu2 %v1021_v3 }
  0x56   :  { %395 = vmatpush.msrb.mxu2 %v1029_v4 }
  0x58   :  { %396 = vmatpush.msrb.mxu2 %v1038_v5 }
  0x5a   :  { %397 = vmatpush.msrb.mxu2 %v1045_v6 }
  0x5c   :  { %398 = vmatpush.msrb.mxu2 %v1064_v9 }
  0x5e   :  { %399 = vmatpush.msrb.mxu2 %v1071_v10 }
  0x60   :  { %400 = vmatpush.msrb.mxu2 %v1080_v11 }
  0x62   :  { %401 = vmatpush.msrb.mxu2 %v1087_v12 }
  0x64   :  { %402 = vmatpush.msrb.mxu2 %v1099_v14 }
  0x66   :  { %403 = vmatpush.msrb.mxu2 %v1106_v15 }
  0x68   :  { %404 = vmatpush.msrb.mxu2 %v1115_v16 }
  0x6a   :  { %405 = vmatpush.msrb.mxu2 %v1122_v17 }
  0x6c   :  { %406 = vmatpush.msrb.mxu2 %v1134_v19 }
  0x6e   :  { %407 = vmatpush.msrb.mxu2 %v1141_v20 }
  0x70   :  { %408 = vmatpush.msrb.mxu2 %v1150_v21 }
  0x72   :  { %409 = vmatpush.msrb.mxu2 %v1157_v22 }
  0x92   :  { %v208_v31 = vpop.f32.mrf.mxu0 }
  0x93   :  { %v209_v32 = vadd.f32 %v208_v31, %v1226_v30  ;;  %v1417_v31 = vld [vmem:[#allocation6 + $0x20] sm:$0xff] }
  0x96   :  { %v240_v24 = vpop.f32.mrf.mxu2 }
  0x9a   :  { %v211_v37 = vpop.f32.mrf.mxu0 }
  0x9b   :  { %v212_v38 = vadd.f32 %v211_v37, %v1226_v30 }
  0x9e   :  { %v242_v25 = vpop.f32.mrf.mxu2 }
  0xa2   :  { %v214_v43 = vpop.f32.mrf.mxu0 }
  0xa3   :  { %v215_v44 = vadd.f32 %v214_v43, %v1226_v30 }
  0xa6   :  { %v244_v27 = vpop.f32.mrf.mxu2 }
  0xa7   :  { %v1403_v27 = vld [vmem:[#allocation6 + $0x30] sm:$0xff] }
  0xaa   :  { %v217_v49 = vpop.f32.mrf.mxu0 }
  0xab   :  { %v218_v50 = vadd.f32 %v217_v49, %v1226_v30 }
  0xae   :  { %v246_v29 = vpop.f32.mrf.mxu2 }
  0xaf   :  { %v1405_v29 = vld [vmem:[#allocation6 + $0x28] sm:$0xff] }
  0xb2   :  { %v220_v55 = vpop.f32.mrf.mxu0 }
  0xb3   :  { %v221_v56 = vadd.f32 %v220_v55, %v1226_v30 }
  0xb6   :  { %v323_v33 = vpop.f32.mrf.mxu2 }
  0xb7   :  { %v326_v34 = vadd.f32 %v323_v33, %v209_v32  ;;  %v1425_v32 = vld [vmem:[#allocation6 + $0x18] sm:$0xff]  ;;  %v1427_v33 = vld [vmem:[#allocation6 + $0x10] sm:$0xff] }
  0xb9   :  { %810 = vtanh.f32 %v326_v34  ;;  %v117_v34 = vld [vmem:[%s1572_s0 + $0x40] sm:$0xff] }
  0xba   :  { %v223_v61 = vpop.f32.mrf.mxu0 }
  0xbb   :  { %v224_v62 = vadd.f32 %v223_v61, %v1226_v30 }
  0xbf   :  { %v811_v35 = vpop.eup %810 }
  0xc0   :  { %344 = vmatmul.f32.vlgmr.msra.gmra.mxu3 %v811_v35  ;;  %v1452_v35 = vld [vmem:[#allocation6 + $0x8] sm:$0xff] }
  0xc1   :  { %416 = vmatpush.msra.mxu3 %v1021_v3 }
  0xc3   :  { %417 = vmatpush.msra.mxu3 %v1029_v4 }
  0xc5   :  { %418 = vmatpush.msra.mxu3 %v1038_v5 }
  0xc7   :  { %419 = vmatpush.msra.mxu3 %v1045_v6 }
  0xc9   :  { %420 = vmatpush.msra.mxu3 %v1064_v9 }
  0xcb   :  { %421 = vmatpush.msra.mxu3 %v1071_v10 }
  0xcd   :  { %422 = vmatpush.msra.mxu3 %v1080_v11 }
  0xcf   :  { %423 = vmatpush.msra.mxu3 %v1087_v12 }
  0xd1   :  { %424 = vmatpush.msra.mxu3 %v1099_v14 }
  0xd3   :  { %425 = vmatpush.msra.mxu3 %v1106_v15 }
  0xd5   :  { %426 = vmatpush.msra.mxu3 %v1115_v16 }
  0xd7   :  { %427 = vmatpush.msra.mxu3 %v1122_v17 }
  0xd9   :  { %428 = vmatpush.msra.mxu3 %v1134_v19 }
  0xdb   :  { %429 = vmatpush.msra.mxu3 %v1141_v20 }
  0xdd   :  { %430 = vmatpush.msra.mxu3 %v1150_v21 }
  0xdf   :  { %431 = vmatpush.msra.mxu3 %v1157_v22 }
 0x143   :  { %v345_v39 = vpop.f32.mrf.mxu3 }
 0x144   :  { %v348_v40 = vadd.f32 %v345_v39, %v212_v38 }
 0x146   :  { %812 = vtanh.f32 %v348_v40 }
 0x14c   :  { %v813_v41 = vpop.eup %812 }
 0x14d   :  { %366 = vmatmul.f32.vlgmr.msra.gmra.mxu2 %v813_v41 }
 0x14e   :  { %438 = vmatpush.msra.mxu2 %v1021_v3 }
 0x150   :  { %439 = vmatpush.msra.mxu2 %v1029_v4 }
 0x152   :  { %440 = vmatpush.msra.mxu2 %v1038_v5 }
 0x154   :  { %441 = vmatpush.msra.mxu2 %v1045_v6 }
 0x156   :  { %442 = vmatpush.msra.mxu2 %v1064_v9 }
 0x158   :  { %443 = vmatpush.msra.mxu2 %v1071_v10 }
 0x15a   :  { %444 = vmatpush.msra.mxu2 %v1080_v11 }
 0x15c   :  { %445 = vmatpush.msra.mxu2 %v1087_v12 }
 0x15e   :  { %446 = vmatpush.msra.mxu2 %v1099_v14 }
 0x160   :  { %447 = vmatpush.msra.mxu2 %v1106_v15 }
 0x162   :  { %448 = vmatpush.msra.mxu2 %v1115_v16 }
 0x164   :  { %449 = vmatpush.msra.mxu2 %v1122_v17 }
 0x166   :  { %450 = vmatpush.msra.mxu2 %v1134_v19 }
 0x168   :  { %451 = vmatpush.msra.mxu2 %v1141_v20 }
 0x16a   :  { %452 = vmatpush.msra.mxu2 %v1150_v21 }
 0x16c   :  { %453 = vmatpush.msra.mxu2 %v1157_v22 }
 0x1d0   :  { %v367_v45 = vpop.f32.mrf.mxu2 }
 0x1d1   :  { %v370_v46 = vadd.f32 %v367_v45, %v215_v44 }
 0x1d3   :  { %814 = vtanh.f32 %v370_v46 }
 0x1d9   :  { %v815_v47 = vpop.eup %814 }
 0x1da   :  { %388 = vmatmul.f32.vlgmr.msrb.gmra.mxu3 %v815_v47 }
 0x1db   :  { %460 = vmatpush.msrb.mxu3 %v1021_v3  ;;  %v1320_v3 = vld [vmem:[%s1572_s0 + $0x38] sm:$0xff] }
 0x1dc   :  { %771 = vmatmul.msk.f32.gmra.mxu0 %vm135_vm1, %v1320_v3 }
 0x1dd   :  { %461 = vmatpush.msrb.mxu3 %v1029_v4  ;;  %v1325_v4 = vld [vmem:[%s1572_s0 + $0x48] sm:$0xff] }
 0x1de   :  { %773 = vmatmul.msk.f32.vlgmr.msra.gmra.mxu1 %vm135_vm1, %v1325_v4 }
 0x1df   :  { %462 = vmatpush.msrb.mxu3 %v1038_v5  ;;  %v128_v5 = vld [vmem:[#allocation3 + $0x18] sm:$0x3] }
 0x1e0   :  { %780 = vmatpush.msk.msrb.mxu1 %vm184_vm0, %v128_v5  ;;  %v685_v5 = vld [vmem:[#allocation8 + $0x58] sm:$0xff] }
 0x1e1   :  { %463 = vmatpush.msrb.mxu3 %v1045_v6  ;;  %v126_v6 = vld [vmem:[#allocation3 + $0x8] sm:$0xff] }
 0x1e2   :  { %263 = vmatpush.msrb.mxu1 %v126_v6  ;;  %v684_v6 = vld [vmem:[#allocation8 + $0x50] sm:$0xff] }
 0x1e3   :  { %464 = vmatpush.msrb.mxu3 %v1064_v9  ;;  %v1332_v9 = vld [vmem:[#allocation6 + $0x78] sm:$0xff] }
 0x1e4   :  { %482 = vmatpush.msrb.mxu0 %v1332_v9  ;;  %505 = vmatpush.msra.mxu1 %v1332_v9 }
 0x1e5   :  { %465 = vmatpush.msrb.mxu3 %v1071_v10  ;;  %v1334_v10 = vld [vmem:[#allocation6 + $0x70] sm:$0xff]  ;;  %772 = vmatmul.msk.f32.gmra.mxu0 %vm135_vm1, %v117_v34 }
 0x1e6   :  { %483 = vmatpush.msrb.mxu0 %v1334_v10  ;;  %506 = vmatpush.msra.mxu1 %v1334_v10 }
 0x1e7   :  { %466 = vmatpush.msrb.mxu3 %v1080_v11  ;;  %v1338_v11 = vld [vmem:[#allocation6 + $0x68] sm:$0xff] }
 0x1e8   :  { %484 = vmatpush.msrb.mxu0 %v1338_v11  ;;  %507 = vmatpush.msra.mxu1 %v1338_v11 }
 0x1e9   :  { %467 = vmatpush.msrb.mxu3 %v1087_v12  ;;  %v1346_v12 = vld [vmem:[%s1572_s0 + $0x50] sm:$0xff] }
 0x1ea   :  { %774 = vmatmul.msk.f32.gmra.mxu1 %vm135_vm1, %v1346_v12 }
 0x1eb   :  { %468 = vmatpush.msrb.mxu3 %v1099_v14  ;;  %v1348_v14 = vld [vmem:[#allocation6 + $0x60] sm:$0xff] }
 0x1ec   :  { %485 = vmatpush.msrb.mxu0 %v1348_v14  ;;  %508 = vmatpush.msra.mxu1 %v1348_v14 }
 0x1ed   :  { %469 = vmatpush.msrb.mxu3 %v1106_v15  ;;  %v1354_v15 = vld [vmem:[#allocation6 + $0x58] sm:$0xff] }
 0x1ee   :  { %486 = vmatpush.msrb.mxu0 %v1354_v15  ;;  %509 = vmatpush.msra.mxu1 %v1354_v15 }
 0x1ef   :  { %470 = vmatpush.msrb.mxu3 %v1115_v16  ;;  %v1361_v16 = vld [vmem:[#allocation6 + $0x50] sm:$0xff] }
 0x1f0   :  { %487 = vmatpush.msrb.mxu0 %v1361_v16  ;;  %510 = vmatpush.msra.mxu1 %v1361_v16 }
 0x1f1   :  { %471 = vmatpush.msrb.mxu3 %v1122_v17  ;;  %v1367_v17 = vld [vmem:[#allocation6 + $0x48] sm:$0xff] }
 0x1f2   :  { %488 = vmatpush.msrb.mxu0 %v1367_v17  ;;  %511 = vmatpush.msra.mxu1 %v1367_v17 }
 0x1f3   :  { %472 = vmatpush.msrb.mxu3 %v1134_v19  ;;  %v1376_v19 = vld [vmem:[%s1572_s0 + $0x58] sm:$0xff] }
 0x1f4   :  { %775 = vmatmul.msk.f32.gmra.mxu1 %vm135_vm1, %v1376_v19 }
 0x1f5   :  { %473 = vmatpush.msrb.mxu3 %v1141_v20  ;;  %v226_v20 = vpop.f32.mrf.mxu0 }
 0x1f6   :  { %v227_v23 = vadd.f32 %v226_v20, %v1226_v30  ;;  %v678_v20 = vld [vmem:[#allocation8 + $0x20] sm:$0xff] }
 0x1f7   :  { %474 = vmatpush.msrb.mxu3 %v1150_v21  ;;  %v1386_v21 = vld [vmem:[#allocation6 + $0x40] sm:$0xff] }
 0x1f8   :  { %489 = vmatpush.msrb.mxu0 %v1386_v21  ;;  %512 = vmatpush.msra.mxu1 %v1386_v21 }
 0x1f9   :  { %475 = vmatpush.msrb.mxu3 %v1157_v22  ;;  %v1388_v22 = vld [vmem:[#allocation6 + $0x38] sm:$0xff] }
 0x1fa   :  { %490 = vmatpush.msrb.mxu0 %v1388_v22  ;;  %513 = vmatpush.msra.mxu1 %v1388_v22 }
 0x1fc   :  { %781 = vmatmul.msk.f32.vlgmr.msrb.gmra.mxu1 %vm135_vm1, %v1050_v7  ;;  %491 = vmatpush.msrb.mxu0 %v1403_v27 }
 0x1fd   :  { %514 = vmatpush.msra.mxu1 %v1403_v27 }
 0x1fe   :  { %492 = vmatpush.msrb.mxu0 %v1405_v29 }
 0x1ff   :  { %515 = vmatpush.msra.mxu1 %v1405_v29 }
 0x200   :  { %493 = vmatpush.msrb.mxu0 %v1417_v31 }
 0x201   :  { %516 = vmatpush.msra.mxu1 %v1417_v31 }
 0x202   :  { %494 = vmatpush.msrb.mxu0 %v1425_v32 }
 0x203   :  { %517 = vmatpush.msra.mxu1 %v1425_v32 }
 0x204   :  { %782 = vmatmul.msk.f32.gmra.mxu1 %vm135_vm1, %v1216_v26  ;;  %495 = vmatpush.msrb.mxu0 %v1427_v33 }
 0x205   :  { %518 = vmatpush.msra.mxu1 %v1427_v33 }
 0x206   :  { %496 = vmatpush.msrb.mxu0 %v1452_v35 }
 0x207   :  { %519 = vmatpush.msra.mxu1 %v1452_v35 }
 0x20c   :  { %783 = vmatmul.msk.f32.gmra.mxu1 %vm135_vm1, %v1248_v36  ;;  %v1454_v36 = vld [vmem:[#allocation6] sm:$0xff] }
 0x20d   :  { %497 = vmatpush.msrb.mxu0 %v1454_v36  ;;  %520 = vmatpush.msra.mxu1 %v1454_v36 }
 0x20f   :  { %574 = vmatpush.msra.mxu0 %v1332_v9  ;;  %597 = vmatpush.msrb.mxu1 %v1332_v9 }
 0x211   :  { %575 = vmatpush.msra.mxu0 %v1334_v10  ;;  %598 = vmatpush.msrb.mxu1 %v1334_v10 }
 0x213   :  { %576 = vmatpush.msra.mxu0 %v1338_v11  ;;  %599 = vmatpush.msrb.mxu1 %v1338_v11 }
 0x214   :  { %784 = vmatmul.msk.f32.gmra.mxu1 %vm135_vm1, %v1272_v42 }
 0x215   :  { %577 = vmatpush.msra.mxu0 %v1348_v14  ;;  %600 = vmatpush.msrb.mxu1 %v1348_v14 }
 0x217   :  { %578 = vmatpush.msra.mxu0 %v1354_v15  ;;  %601 = vmatpush.msrb.mxu1 %v1354_v15 }
 0x219   :  { %579 = vmatpush.msra.mxu0 %v1361_v16  ;;  %602 = vmatpush.msrb.mxu1 %v1361_v16 }
 0x21b   :  { %580 = vmatpush.msra.mxu0 %v1367_v17  ;;  %603 = vmatpush.msrb.mxu1 %v1367_v17 }
 0x21c   :  { %785 = vmatmul.msk.f32.gmra.mxu1 %vm135_vm1, %v1296_v48 }
 0x21d   :  { %581 = vmatpush.msra.mxu0 %v1386_v21  ;;  %604 = vmatpush.msrb.mxu1 %v1386_v21 }
 0x21f   :  { %582 = vmatpush.msra.mxu0 %v1388_v22  ;;  %605 = vmatpush.msrb.mxu1 %v1388_v22 }
 0x221   :  { %583 = vmatpush.msra.mxu0 %v1403_v27  ;;  %606 = vmatpush.msrb.mxu1 %v1403_v27 }
 0x223   :  { %584 = vmatpush.msra.mxu0 %v1405_v29  ;;  %607 = vmatpush.msrb.mxu1 %v1405_v29 }
 0x224   :  { %786 = vmatmul.msk.f32.gmra.mxu1 %vm135_vm1, %v1304_v54 }
 0x225   :  { %585 = vmatpush.msra.mxu0 %v1417_v31  ;;  %608 = vmatpush.msrb.mxu1 %v1417_v31 }
 0x227   :  { %586 = vmatpush.msra.mxu0 %v1425_v32  ;;  %609 = vmatpush.msrb.mxu1 %v1425_v32 }
 0x229   :  { %587 = vmatpush.msra.mxu0 %v1427_v33  ;;  %610 = vmatpush.msrb.mxu1 %v1427_v33 }
 0x22b   :  { %588 = vmatpush.msra.mxu0 %v1452_v35  ;;  %611 = vmatpush.msrb.mxu1 %v1452_v35 }
 0x22c   :  { %787 = vmatmul.msk.f32.gmra.mxu1 %vm135_vm1, %v1312_v60 }
 0x22d   :  { %589 = vmatpush.msra.mxu0 %v1454_v36  ;;  %612 = vmatpush.msrb.mxu1 %v1454_v36 }
 0x234   :  { %788 = vmatmul.msk.f32.gmra.mxu1 %vm135_vm1, %v1320_v3  ;;  %v687_v3 = vld [vmem:[#allocation8 + $0x68] sm:$0xff] }
 0x23c   :  { %789 = vmatmul.msk.f32.gmra.mxu1 %vm135_vm1, %v117_v34 }
 0x244   :  { %790 = vmatmul.msk.f32.gmra.mxu1 %vm135_vm1, %v1325_v4  ;;  %v686_v4 = vld [vmem:[#allocation8 + $0x60] sm:$0xff] }
 0x24c   :  { %791 = vmatmul.msk.f32.gmra.mxu1 %vm135_vm1, %v1346_v12 }
 0x254   :  { %792 = vmatmul.msk.f32.gmra.mxu1 %vm135_vm1, %v1376_v19  ;;  %v679_v19 = vld [vmem:[#allocation8 + $0x28] sm:$0xff] }
 0x259   :  { %v229_v40 = vpop.f32.mrf.mxu0 }
 0x25a   :  { %v230_v42 = vadd.f32 %v229_v40, %v1226_v30 }
 0x25b   :  { %v234_v26 = vpop.f32.mrf.mxu1 }
 0x25c   :  { %793 = vmatmul.msk.f32.gmra.mxu1 %vm135_vm1, %v1016_v2  ;;  %v809_v26 = vld [vmem:[%s1579_s7] ss:$0 sm:$0xff]  ;;  %s951_s7 = smov [#allocation9]  }
 0x25d   :  { %v389_v51 = vpop.f32.mrf.mxu3  ;;  %s747_s20 = sshll.u32 %s951_s7, 4  ;;  %s748_s20 = int_to_ptr.vmem [resolvable:$true] %s747_s20 }
 0x25e   :  { %v392_v52 = vadd.f32 %v389_v51, %v218_v50 }
 0x260   :  { %816 = vtanh.f32 %v392_v52 }
 0x262   :  { %v232_v50 = vpop.f32.mrf.mxu0 }
 0x264   :  { %794 = vmatmul.msk.f32.gmra.mxu1 %vm135_vm1, %v1059_v8  ;;  %v1544_v8 = vperm.slane %v1223_v28, 1 }
 0x266   :  { %v817_v53 = vpop.eup %816 }
 0x267   :  { %410 = vmatmul.f32.vlgmr.msrb.gmra.mxu2 %v817_v53  ;;  %v236_v37 = vpop.f32.mrf.mxu1 }
 0x268   :  { %528 = vmatpush.msrb.mxu2 %v1332_v9 }
 0x26a   :  { %529 = vmatpush.msrb.mxu2 %v1334_v10 }
 0x26c   :  { %530 = vmatpush.msrb.mxu2 %v1338_v11  ;;  %795 = vmatmul.msk.f32.gmra.mxu1 %vm135_vm1, %v1094_v13 }
 0x26e   :  { %531 = vmatpush.msrb.mxu2 %v1348_v14 }
 0x270   :  { %532 = vmatpush.msrb.mxu2 %v1354_v15 }
 0x271   :  { %v238_v38 = vpop.f32.mrf.mxu1 }
 0x272   :  { %533 = vmatpush.msrb.mxu2 %v1361_v16 }
 0x274   :  { %534 = vmatpush.msrb.mxu2 %v1367_v17  ;;  %796 = vmatmul.msk.f32.gmra.mxu1 %vm135_vm1, %v1129_v18 }
 0x276   :  { %535 = vmatpush.msrb.mxu2 %v1386_v21 }
 0x278   :  { %536 = vmatpush.msrb.mxu2 %v1388_v22 }
 0x279   :  { %v265_v39 = vpop.f32.mrf.mxu1 }
 0x27a   :  { %537 = vmatpush.msrb.mxu2 %v1403_v27 }
 0x27c   :  { %538 = vmatpush.msrb.mxu2 %v1405_v29 }
 0x27e   :  { %539 = vmatpush.msrb.mxu2 %v1417_v31 }
 0x280   :  { %540 = vmatpush.msrb.mxu2 %v1425_v32 }
 0x281   :  { %v267_v41 = vpop.f32.mrf.mxu1 }
 0x282   :  { %541 = vmatpush.msrb.mxu2 %v1427_v33 }
 0x284   :  { %542 = vmatpush.msrb.mxu2 %v1452_v35 }
 0x286   :  { %543 = vmatpush.msrb.mxu2 %v1454_v36 }
 0x289   :  { %v269_v30 = vpop.f32.mrf.mxu1 }
 0x291   :  { %v271_v45 = vpop.f32.mrf.mxu1 }
 0x299   :  { %v273_v46 = vpop.f32.mrf.mxu1 }
 0x2a1   :  { %v275_v47 = vpop.f32.mrf.mxu1 }
 0x2a9   :  { %v277_v48 = vpop.f32.mrf.mxu1 }
 0x2b1   :  { %v279_v49 = vpop.f32.mrf.mxu1 }
 0x2b9   :  { %v281_v51 = vpop.f32.mrf.mxu1 }
 0x2ba   :  { %v282_v52 = vadd.f32 %v281_v51, %v1544_v8 }
 0x2c1   :  { %v284_v13 = vpop.f32.mrf.mxu1 }
 0x2c2   :  { %v285_v28 = vadd.f32 %v284_v13, %v1544_v8 }
 0x2ea   :  { %v411_v57 = vpop.f32.mrf.mxu2 }
 0x2eb   :  { %v414_v58 = vadd.f32 %v411_v57, %v221_v56  ;;  %v287_v56 = vpop.f32.mrf.mxu1 }
 0x2ed   :  { %818 = vtanh.f32 %v414_v58 }
 0x2f3   :  { %v819_v59 = vpop.eup %818  ;;  %v290_v57 = vpop.f32.mrf.mxu1 }
 0x2f4   :  { %432 = vmatmul.f32.vlgmr.msra.gmra.mxu3 %v819_v59 }
 0x2f5   :  { %551 = vmatpush.msra.mxu3 %v1332_v9 }
 0x2f7   :  { %552 = vmatpush.msra.mxu3 %v1334_v10 }
 0x2f9   :  { %553 = vmatpush.msra.mxu3 %v1338_v11 }
 0x2fb   :  { %554 = vmatpush.msra.mxu3 %v1348_v14  ;;  %v293_v58 = vpop.f32.mrf.mxu1 }
 0x2fd   :  { %555 = vmatpush.msra.mxu3 %v1354_v15 }
 0x2ff   :  { %556 = vmatpush.msra.mxu3 %v1361_v16 }
 0x301   :  { %557 = vmatpush.msra.mxu3 %v1367_v17 }
 0x303   :  { %558 = vmatpush.msra.mxu3 %v1386_v21  ;;  %v1547_v18 = vpop.f32.mrf.mxu1 }
 0x305   :  { %559 = vmatpush.msra.mxu3 %v1388_v22 }
 0x307   :  { %560 = vmatpush.msra.mxu3 %v1403_v27 }
 0x309   :  { %561 = vmatpush.msra.mxu3 %v1405_v29 }
 0x30b   :  { %562 = vmatpush.msra.mxu3 %v1417_v31  ;;  %v1549_v59 = vpop.f32.mrf.mxu1 }
 0x30c   :  { %v300_v49 = vadd.f32 %v1549_v59, %v1544_v8 }
 0x30d   :  { %563 = vmatpush.msra.mxu3 %v1425_v32 }
 0x30f   :  { %564 = vmatpush.msra.mxu3 %v1427_v33 }
 0x311   :  { %565 = vmatpush.msra.mxu3 %v1452_v35 }
 0x313   :  { %566 = vmatpush.msra.mxu3 %v1454_v36  ;;  %v1551_v60 = vpop.f32.mrf.mxu1 }
 0x377   :  { %v433_v63 = vpop.f32.mrf.mxu3 }
 0x378   :  { %v436_v0 = vadd.f32 %v433_v63, %v224_v62 }
 0x37a   :  { %820 = vtanh.f32 %v436_v0  ;;  %v689_v0 = vld [vmem:[#allocation8 + $0x78] sm:$0xff] }
 0x380   :  { %v821_v1 = vpop.eup %820 }
 0x381   :  { %454 = vmatmul.f32.vlgmr.msra.gmra.mxu2 %v821_v1  ;;  %v688_v1 = vld [vmem:[#allocation8 + $0x70] sm:$0xff] }
 0x382   :  { %620 = vmatpush.msra.mxu2 %v1332_v9 }
 0x384   :  { %621 = vmatpush.msra.mxu2 %v1334_v10 }
 0x386   :  { %622 = vmatpush.msra.mxu2 %v1338_v11 }
 0x388   :  { %623 = vmatpush.msra.mxu2 %v1348_v14 }
 0x38a   :  { %624 = vmatpush.msra.mxu2 %v1354_v15 }
 0x38c   :  { %625 = vmatpush.msra.mxu2 %v1361_v16 }
 0x38e   :  { %626 = vmatpush.msra.mxu2 %v1367_v17 }
 0x390   :  { %627 = vmatpush.msra.mxu2 %v1386_v21 }
 0x392   :  { %628 = vmatpush.msra.mxu2 %v1388_v22 }
 0x394   :  { %629 = vmatpush.msra.mxu2 %v1403_v27 }
 0x396   :  { %630 = vmatpush.msra.mxu2 %v1405_v29 }
 0x398   :  { %631 = vmatpush.msra.mxu2 %v1417_v31 }
 0x39a   :  { %632 = vmatpush.msra.mxu2 %v1425_v32 }
 0x39c   :  { %633 = vmatpush.msra.mxu2 %v1427_v33 }
 0x39e   :  { %634 = vmatpush.msra.mxu2 %v1452_v35 }
 0x3a0   :  { %635 = vmatpush.msra.mxu2 %v1454_v36 }
 0x404   :  { %v455_v24 = vpop.f32.mrf.mxu2 }
 0x405   :  { %v458_v25 = vadd.f32 %v455_v24, %v227_v23  ;;  %v675_v23 = vld [vmem:[#allocation8 + $0x8] sm:$0xff]  ;;  %v674_v24 = vld [vmem:[#allocation8] sm:$0xff] }
 0x407   :  { %822 = vtanh.f32 %v458_v25  ;;  %v291_v25 = vadd.f32 %v290_v57, %v1544_v8 }
 0x40d   :  { %v823_v7 = vpop.eup %822 }
 0x40e   :  { %476 = vmatmul.f32.vlgmr.msrb.gmra.mxu3 %v823_v7 }
 0x40f   :  { %643 = vmatpush.msrb.mxu3 %v1332_v9  ;;  %v683_v9 = vld [vmem:[#allocation8 + $0x48] sm:$0xff] }
 0x411   :  { %644 = vmatpush.msrb.mxu3 %v1334_v10  ;;  %v288_v10 = vadd.f32 %v287_v56, %v1544_v8 }
 0x413   :  { %645 = vmatpush.msrb.mxu3 %v1338_v11 }
 0x415   :  { %646 = vmatpush.msrb.mxu3 %v1348_v14 }
 0x417   :  { %647 = vmatpush.msrb.mxu3 %v1354_v15  ;;  %v682_v15 = vld [vmem:[#allocation8 + $0x40] sm:$0xff] }
 0x419   :  { %648 = vmatpush.msrb.mxu3 %v1361_v16  ;;  %v681_v16 = vld [vmem:[#allocation8 + $0x38] sm:$0xff] }
 0x41b   :  { %649 = vmatpush.msrb.mxu3 %v1367_v17  ;;  %v680_v17 = vld [vmem:[#allocation8 + $0x30] sm:$0xff] }
 0x41d   :  { %650 = vmatpush.msrb.mxu3 %v1386_v21  ;;  %v677_v21 = vld [vmem:[#allocation8 + $0x18] sm:$0xff] }
 0x41f   :  { %651 = vmatpush.msrb.mxu3 %v1388_v22  ;;  %v676_v22 = vld [vmem:[#allocation8 + $0x10] sm:$0xff] }
 0x421   :  { %652 = vmatpush.msrb.mxu3 %v1403_v27 }
 0x423   :  { %653 = vmatpush.msrb.mxu3 %v1405_v29 }
 0x425   :  { %654 = vmatpush.msrb.mxu3 %v1417_v31  ;;  %v294_v31 = vadd.f32 %v293_v58, %v1544_v8 }
 0x427   :  { %655 = vmatpush.msrb.mxu3 %v1425_v32 }
 0x429   :  { %656 = vmatpush.msrb.mxu3 %v1427_v33 }
 0x42b   :  { %657 = vmatpush.msrb.mxu3 %v1452_v35 }
 0x42d   :  { %658 = vmatpush.msrb.mxu3 %v1454_v36 }
 0x491   :  { %v477_v43 = vpop.f32.mrf.mxu3 }
 0x492   :  { %v480_v44 = vadd.f32 %v477_v43, %v230_v42  ;;  %v297_v43 = vadd.f32 %v1547_v18, %v1544_v8 }
 0x494   :  { %824 = vtanh.f32 %v480_v44 }
 0x49a   :  { %v825_v2 = vpop.eup %824 }
 0x49b   :  { %498 = vmatmul.f32.vlgmr.msrb.gmra.mxu0 %v825_v2 }
 0x49c   :  { %694 = vmatpush.msrb.mxu0 %v689_v0 }
 0x49e   :  { %695 = vmatpush.msrb.mxu0 %v688_v1 }
 0x4a0   :  { %696 = vmatpush.msrb.mxu0 %v687_v3 }
 0x4a2   :  { %697 = vmatpush.msrb.mxu0 %v686_v4 }
 0x4a4   :  { %698 = vmatpush.msrb.mxu0 %v685_v5 }
 0x4a6   :  { %699 = vmatpush.msrb.mxu0 %v684_v6 }
 0x4a8   :  { %700 = vmatpush.msrb.mxu0 %v683_v9 }
 0x4aa   :  { %701 = vmatpush.msrb.mxu0 %v682_v15 }
 0x4ac   :  { %702 = vmatpush.msrb.mxu0 %v681_v16 }
 0x4ae   :  { %703 = vmatpush.msrb.mxu0 %v680_v17 }
 0x4b0   :  { %704 = vmatpush.msrb.mxu0 %v679_v19 }
 0x4b2   :  { %705 = vmatpush.msrb.mxu0 %v678_v20 }
 0x4b4   :  { %706 = vmatpush.msrb.mxu0 %v677_v21 }
 0x4b6   :  { %707 = vmatpush.msrb.mxu0 %v676_v22 }
 0x4b8   :  { %708 = vmatpush.msrb.mxu0 %v675_v23 }
 0x4ba   :  { %709 = vmatpush.msrb.mxu0 %v674_v24 }
 0x518   :  { %v499_v53 = vpop.f32.mrf.mxu0 }
 0x519   :  { %v502_v54 = vadd.f32 %v499_v53, %v282_v52 }
 0x51b   :  { %826 = vtanh.f32 %v502_v54 }
 0x521   :  { %v827_v55 = vpop.eup %826 }
 0x522   :  { %521 = vmatmul.f32.vlgmr.msra.gmra.mxu1 %v827_v55 }
 0x59f   :  { %v522_v61 = vpop.f32.mrf.mxu1 }
 0x5a0   :  { %v525_v62 = vadd.f32 %v522_v61, %v285_v28 }
 0x5a2   :  { %828 = vtanh.f32 %v525_v62 }
 0x5a8   :  { %v829_v63 = vpop.eup %828 }
 0x5a9   :  { %544 = vmatmul.f32.vlgmr.msrb.gmra.mxu2 %v829_v63 }
 0x62c   :  { %v545_v11 = vpop.f32.mrf.mxu2 }
 0x62d   :  { %v548_v12 = vadd.f32 %v545_v11, %v288_v10 }
 0x62f   :  { %830 = vtanh.f32 %v548_v12 }
 0x635   :  { %v831_v14 = vpop.eup %830 }
 0x636   :  { %567 = vmatmul.f32.vlgmr.msra.gmra.mxu3 %v831_v14 }
 0x6b9   :  { %v568_v27 = vpop.f32.mrf.mxu3 }
 0x6ba   :  { %v571_v29 = vadd.f32 %v568_v27, %v291_v25 }
 0x6bc   :  { %832 = vtanh.f32 %v571_v29 }
 0x6c2   :  { %v833_v7 = vpop.eup %832 }
 0x6c3   :  { %590 = vmatmul.f32.vlgmr.msra.gmra.mxu0 %v833_v7 }
 0x6cb   :  { %710 = vmatmul.f32.vlgmr.msrb.gmra.mxu0 %v827_v55  ;;  %v303_v55 = vadd.f32 %v1551_v60, %v1544_v8 }
 0x6d3   :  { %713 = vmatmul.f32.gmra.mxu0 %v829_v63 }
 0x6db   :  { %716 = vmatmul.f32.gmra.mxu0 %v831_v14 }
 0x6e3   :  { %719 = vmatmul.f32.gmra.mxu0 %v833_v7 }
 0x740   :  { %v591_v32 = vpop.f32.mrf.mxu0 }
 0x741   :  { %v594_v33 = vadd.f32 %v591_v32, %v294_v31 }
 0x743   :  { %834 = vtanh.f32 %v594_v33 }
 0x748   :  { %v711_v34 = vpop.f32.mrf.mxu0 }
 0x749   :  { %v835_v35 = vpop.eup %834  ;;  %v712_v36 = vadd.f32 %v809_v26, %v711_v34 }
 0x74a   :  { %613 = vmatmul.f32.vlgmr.msrb.gmra.mxu1 %v835_v35  ;;  %722 = vmatmul.f32.gmra.mxu0 %v835_v35 }
 0x74b   :  { %735 = vst [vmem:[#allocation9] sm:$0xff] %v712_v36 }
 0x750   :  { %v714_v37 = vpop.f32.mrf.mxu0 }
 0x751   :  { %v715_v38 = vadd.f32 %v809_v26, %v714_v37 }
 0x753   :  { %736 = vst [vmem:[#allocation9 + $0x8] sm:$0xff] %v715_v38 }
 0x758   :  { %v717_v39 = vpop.f32.mrf.mxu0 }
 0x759   :  { %v718_v40 = vadd.f32 %v809_v26, %v717_v39 }
 0x75b   :  { %737 = vst [vmem:[#allocation9 + $0x10] sm:$0xff] %v718_v40 }
 0x760   :  { %v720_v41 = vpop.f32.mrf.mxu0 }
 0x761   :  { %v721_v42 = vadd.f32 %v809_v26, %v720_v41 }
 0x763   :  { %738 = vst [vmem:[#allocation9 + $0x18] sm:$0xff] %v721_v42 }
 0x7c7   :  { %v614_v44 = vpop.f32.mrf.mxu1  ;;  %v723_v30 = vpop.f32.mrf.mxu0 }
 0x7c8   :  { %v617_v2 = vadd.f32 %v614_v44, %v297_v43  ;;  %v724_v45 = vadd.f32 %v809_v26, %v723_v30 }
 0x7ca   :  { %836 = vtanh.f32 %v617_v2  ;;  %739 = vst [vmem:[#allocation9 + $0x20] sm:$0xff] %v724_v45 }
 0x7d0   :  { %v837_v46 = vpop.eup %836 }
 0x7d1   :  { %636 = vmatmul.f32.vlgmr.msra.gmra.mxu2 %v837_v46  ;;  %725 = vmatmul.f32.gmra.mxu0 %v837_v46 }
 0x84e   :  { %v726_v47 = vpop.f32.mrf.mxu0 }
 0x84f   :  { %v727_v48 = vadd.f32 %v809_v26, %v726_v47 }
 0x851   :  { %740 = vst [vmem:[#allocation9 + $0x28] sm:$0xff] %v727_v48 }
 0x854   :  { %v637_v50 = vpop.f32.mrf.mxu2 }
 0x855   :  { %v640_v51 = vadd.f32 %v637_v50, %v300_v49 }
 0x857   :  { %838 = vtanh.f32 %v640_v51 }
 0x85d   :  { %v839_v52 = vpop.eup %838 }
 0x85e   :  { %659 = vmatmul.f32.vlgmr.msrb.gmra.mxu3 %v839_v52  ;;  %728 = vmatmul.f32.gmra.mxu0 %v839_v52 }
 0x8db   :  { %v729_v53 = vpop.f32.mrf.mxu0 }
 0x8dc   :  { %v730_v54 = vadd.f32 %v809_v26, %v729_v53 }
 0x8de   :  { %741 = vst [vmem:[#allocation9 + $0x30] sm:$0xff] %v730_v54 }
 0x8e1   :  { %v660_v13 = vpop.f32.mrf.mxu3 }
 0x8e2   :  { %v663_v56 = vadd.f32 %v660_v13, %v303_v55 }
 0x8e4   :  { %840 = vtanh.f32 %v663_v56 }
 0x8ea   :  { %v841_v57 = vpop.eup %840 }
 0x8eb   :  { %731 = vmatmul.f32.gmra.mxu0 %v841_v57 }
 0x968   :  { %v732_v58 = vpop.f32.mrf.mxu0 }
 0x969   :  { %v733_v18 = vadd.f32 %v809_v26, %v732_v58 }
 0x96b   :  { %742 = vst [vmem:[#allocation9 + $0x38] sm:$0xff] %v733_v18 }
 0x96c   :  { %755 = dma.vmem_to_hbm [thread:$0]  %s748_s20, 1024, %s750_s21, [#allocation5], %s945_s13, %s945_s13, %s946_s14  }
 0x96d   :  { %942 = dma.done.wait [#allocation5], 1024  }
 0x96e   :  { %943 = vsyncadd [#allocation5], 4294966272 }
 0x96f   :  { %760 = vsyncpa [#allocation4], 1 }
 0x970   :  { %761 = vsyncpa [#allocation7], 1 }
 0x971   :  { %762 = vsyncpa [#allocation5], 1 }

</bundles_post_ra>
